<compile_context>
chip_gen: v5e
topology: v5e:2x2
jax: 0.10.0
libtpu: 0.0.40
codegen_flags: <defaults>
</compile_context>

<pallas_src>
import functools

import jax
import jax.numpy as jnp
from jax.experimental import pallas as pl
from jax.experimental.pallas import tpu as pltpu

_INV_SQRT2 = 0.7071067811865476
_SQRT2 = 1.4142135623730951
_ERF_P = 0.3275911
_A1, _A2, _A3, _A4, _A5 = (0.254829592, -0.284496736, 1.421413741,
                           -1.453152027, 1.061405429)


# ----------------------------------------------------------------------------
# In-kernel GELU (erf-based, matches PyTorch nn.GELU() default to ~1e-6).
#   erf(z) = sign(z) * (1 - poly(t) * exp(-z^2)),  t = 1/(1 + p*|z|)
#   GELU(x) = 0.5*x*(1 + erf(x/sqrt2)) = 0.5*(x + |x|*(1 - poly*exp(-x^2/2)))
# (odd symmetry folds the sign select away; reciprocal + exp run on the EUP).
# ----------------------------------------------------------------------------
def _gelu_erf(x):
    ax = jnp.abs(x)
    az = ax * _INV_SQRT2
    t = pl.reciprocal(1.0 + _ERF_P * az, approx=True)          # EUP slot
    poly = ((((_A5 * t + _A4) * t + _A3) * t + _A2) * t + _A1) * t
    e = jnp.exp(-0.5 * (x * x))                                 # EUP slot
    return 0.5 * (x + ax * (1.0 - poly * e))


# ----------------------------------------------------------------------------
# Single fused MLP kernel on the TRANSPOSED layout (features on sublanes,
# rows on lanes).  refs = (xT, wT_pre, b_pre, [wT_i, b_i]*n_layers,
#                          wT_post, b_post, oT)
# Weights arrive pre-transposed: wT has shape (n_out, n_in); b has (n_out, 1).
# ----------------------------------------------------------------------------
def _mlp_fused_kernel(*refs, n_layers, res):
    xT_ref = refs[0]
    o_ref = refs[-1]
    wT_pre, b_pre = refs[1], refs[2]
    wT_post, b_post = refs[3 + 2 * n_layers], refs[4 + 2 * n_layers]

    xT = xT_ref[...].astype(jnp.float32)                       # (n_input, rows)
    h = _gelu_erf(jnp.dot(wT_pre[...], xT,
                          preferred_element_type=jnp.float32) + b_pre[...])
    for i in range(n_layers):                                   # static unroll
        wT = refs[3 + 2 * i]
        b = refs[4 + 2 * i]
        y = _gelu_erf(jnp.dot(wT[...], h,
                              preferred_element_type=jnp.float32) + b[...])
        h = y + h if res else y
    out = jnp.dot(wT_post[...], h,
                  preferred_element_type=jnp.float32) + b_post[...]
    o_ref[...] = out.astype(o_ref.dtype)                        # lane-dense store


# ----------------------------------------------------------------------------
# Tiling / budget helpers.
# ----------------------------------------------------------------------------
def _has_two_tensorcores():
    # v7x has two TensorCores per chip; v5e/v6e have one.
    try:
        kind = jax.devices()[0].device_kind.lower()
    except Exception:
        return False
    return "v7" in kind


def _pick_row_block(m_pad, two_core):
    """Rows sit on the LANE axis: tiles must be multiples of 128 dividing m_pad."""
    assert m_pad % 128 == 0
    cap = 1024 if two_core else 2048          # v7x per-core VMEM is half of v5e/v6e
    tiles = 2 if (two_core and m_pad >= 256) else 1   # 2-way split only for 2 TCs
    tiles = max(tiles, pl.cdiv(m_pad, cap))           # bound per-tile VMEM at large M
    n128 = m_pad // 128
    while n128 % tiles:                        # keep tiles a 128-multiple divisor
        tiles += 1
    return m_pad // tiles


def _vmem_limit_bytes(row_block, n_input, n_hidden, n_output, n_layers):
    f32 = 4
    act = 2 * (n_input + n_output) * row_block * f32          # double-buffered x/out
    wts = (n_input * n_hidden + n_layers * n_hidden * n_hidden
           + n_hidden * n_output + (n_layers + 1) * n_hidden + n_output) * f32
    live = 6 * n_hidden * row_block * f32                      # f32 h/y/GELU temps
    total = act + wts + live
    return int(min(100 * 1024 * 1024, max(4 * 1024 * 1024, 2 * total)))


# ----------------------------------------------------------------------------
# Wrapper: flattens leading dims, transposes to (features, rows), pads rows to
# a multiple of 128, keeps all weights VMEM-resident across the grid.
# ----------------------------------------------------------------------------
def mlp_forward(x, params, *, res=True, row_block=None):
    w_pre, b_pre = params["w_pre"], params["b_pre"]
    hidden = params["hidden"]                     # list of (w, b), w is (in, out)
    w_post, b_post = params["w_post"], params["b_post"]
    n_layers = len(hidden)

    n_input = x.shape[-1]
    n_hidden = w_pre.shape[1]
    n_output = w_post.shape[1]
    lead_shape = x.shape[:-1]

    x2 = x.reshape(-1, n_input)
    M = x2.shape[0]
    M_pad = max(128, ((M + 127) // 128) * 128)    # rows -> lane axis, pad to 128
    xT = x2.T                                     # (n_input, M) layout plumbing
    if M_pad != M:
        xT = jnp.pad(xT, ((0, 0), (0, M_pad - M)))

    two_core = _has_two_tensorcores()
    if row_block is None:
        row_block = _pick_row_block(M_pad, two_core)
    assert M_pad % row_block == 0 and row_block % 128 == 0, (M_pad, row_block)
    grid = (M_pad // row_block,)

    # Pre-transposed weights: in-kernel dot is (out,in) @ (in,rows) -> (out,rows).
    weight_args = [w_pre.T, b_pre.reshape(n_hidden, 1)]
    for (w, b) in hidden:
        weight_args += [w.T, b.reshape(n_hidden, 1)]
    weight_args += [w_post.T, b_post.reshape(n_output, 1)]

    def full_spec(arr):
        # Constant index_map => block is revisited (VMEM-resident), not re-DMA'd.
        return pl.BlockSpec(arr.shape, lambda i: (0,) * arr.ndim)

    in_specs = [pl.BlockSpec((n_input, row_block), lambda i: (0, i))]
    in_specs += [full_spec(a) for a in weight_args]

    outT = pl.pallas_call(
        functools.partial(_mlp_fused_kernel, n_layers=n_layers, res=res),
        out_shape=jax.ShapeDtypeStruct((n_output, M_pad), x.dtype),
        grid_spec=pltpu.PrefetchScalarGridSpec(
            num_scalar_prefetch=0,
            grid=grid,
            in_specs=in_specs,
            out_specs=pl.BlockSpec((n_output, row_block), lambda i: (0, i)),
        ),
        compiler_params=pltpu.CompilerParams(
            dimension_semantics=("parallel",),
            vmem_limit_bytes=_vmem_limit_bytes(row_block, n_input, n_hidden,
                                               n_output, n_layers),
        ),
    )(xT, *weight_args)

    out = outT[:, :M].T                           # drop row padding, back to (M, out)
    return out.reshape(*lead_shape, n_output)


# ----------------------------------------------------------------------------
# Pure-JAX reference (exact erf GELU) for correctness check.
# ----------------------------------------------------------------------------
def mlp_ref(x, params, *, res=True):
    def gelu(v):
        return 0.5 * v * (1.0 + jax.scipy.special.erf(v / _SQRT2))

    h = gelu(x @ params["w_pre"] + params["b_pre"])
    for (w, b) in params["hidden"]:
        y = gelu(h @ w + b)
        h = y + h if res else y
    return h @ params["w_post"] + params["b_post"]


# ----------------------------------------------------------------------------
# Deterministic synthetic parameter init (weights stored as (in, out)).
# ----------------------------------------------------------------------------
def init_params(key, n_input, n_hidden, n_output, n_layers):
    keys = iter(jax.random.split(key, 2 * (n_layers + 2)))

    def lin(n_in, n_out):
        w = 0.02 * jax.random.normal(next(keys), (n_in, n_out), jnp.float32)
        b = 0.01 * jax.random.normal(next(keys), (1, n_out), jnp.float32)
        return w, b

    params = {}
    params["w_pre"], params["b_pre"] = lin(n_input, n_hidden)
    params["hidden"] = [lin(n_hidden, n_hidden) for _ in range(n_layers)]
    params["w_post"], params["b_post"] = lin(n_hidden, n_output)
    return params


if __name__ == "__main__":
    B, N = 2, 64                       # 128 rows total -> one 128-lane tile
    n_input, n_hidden, n_output, n_layers = 8, 32, 16, 2

    key = jax.random.PRNGKey(0)
    kp, kx = jax.random.split(key)
    params = init_params(kp, n_input, n_hidden, n_output, n_layers)
    x = jax.random.normal(kx, (B, N, n_input), jnp.float32)

    y = mlp_forward(x, params, res=True)
    y = jax.block_until_ready(y)

    assert y.shape == (B, N, n_output), y.shape
    assert bool(jnp.all(jnp.isfinite(y)))

    y_ref = mlp_ref(x, params, res=True)
    max_err = float(jnp.max(jnp.abs(y - y_ref)))
    # 5e-4 budget covers the EUP approx-reciprocal inside the A&S erf polynomial
    # (observed error is far smaller at these activation magnitudes).
    assert jnp.allclose(y, y_ref, atol=5e-4, rtol=5e-4), max_err

    print("KERNEL_OK")
</pallas_src>

<mosaic_0001>
module attributes {stable_mosaic.version = 11 : i64} {
  func.func @_mlp_fused_kernel(%arg0: i32, %arg1: memref<8x128xf32, #tpu.memory_space<vmem>>, %arg2: memref<32x8xf32, #tpu.memory_space<vmem>>, %arg3: memref<32x1xf32, #tpu.memory_space<vmem>>, %arg4: memref<32x32xf32, #tpu.memory_space<vmem>>, %arg5: memref<32x1xf32, #tpu.memory_space<vmem>>, %arg6: memref<32x32xf32, #tpu.memory_space<vmem>>, %arg7: memref<32x1xf32, #tpu.memory_space<vmem>>, %arg8: memref<16x32xf32, #tpu.memory_space<vmem>>, %arg9: memref<16x1xf32, #tpu.memory_space<vmem>>, %arg10: memref<16x128xf32, #tpu.memory_space<vmem>>) attributes {dimension_semantics = [#tpu.dimension_semantics<parallel>], iteration_bounds = array<i64: 1>, scalar_prefetch = 0 : i64, scratch_operands = 0 : i64, tpu.core_type = #tpu.core_type<tc>, window_params = [{transform_indices = @transform_0, window_bounds = array<i64: 8, 128>}, {pipeline_mode = #tpu.pipeline_mode<synchronous>, transform_indices = @transform_1, window_bounds = array<i64: 32, 8>}, {pipeline_mode = #tpu.pipeline_mode<synchronous>, transform_indices = @transform_2, window_bounds = array<i64: 32, 1>}, {pipeline_mode = #tpu.pipeline_mode<synchronous>, transform_indices = @transform_3, window_bounds = array<i64: 32, 32>}, {pipeline_mode = #tpu.pipeline_mode<synchronous>, transform_indices = @transform_4, window_bounds = array<i64: 32, 1>}, {pipeline_mode = #tpu.pipeline_mode<synchronous>, transform_indices = @transform_5, window_bounds = array<i64: 32, 32>}, {pipeline_mode = #tpu.pipeline_mode<synchronous>, transform_indices = @transform_6, window_bounds = array<i64: 32, 1>}, {pipeline_mode = #tpu.pipeline_mode<synchronous>, transform_indices = @transform_7, window_bounds = array<i64: 16, 32>}, {pipeline_mode = #tpu.pipeline_mode<synchronous>, transform_indices = @transform_8, window_bounds = array<i64: 16, 1>}, {transform_indices = @transform_9, window_bounds = array<i64: 16, 128>}]} {
    %c0 = arith.constant 0 : index
    %c0_0 = arith.constant 0 : index
    %0 = vector.load %arg1[%c0, %c0_0] : memref<8x128xf32, #tpu.memory_space<vmem>>, vector<8x128xf32>
    %c0_1 = arith.constant 0 : index
    %c0_2 = arith.constant 0 : index
    %1 = vector.load %arg2[%c0_1, %c0_2] : memref<32x8xf32, #tpu.memory_space<vmem>>, vector<32x8xf32>
    %cst = arith.constant dense<0.000000e+00> : vector<32x128xf32>
    %2 = tpu.matmul %1, %0, %cst {dimension_numbers = #tpu.dot_dimension_numbers<[1], [0], [0], [1], [0, 0, 1, 1], [], []>} : vector<32x8xf32>, vector<8x128xf32>, vector<32x128xf32> -> vector<32x128xf32>
    %c0_3 = arith.constant 0 : index
    %c0_4 = arith.constant 0 : index
    %3 = vector.load %arg3[%c0_3, %c0_4] : memref<32x1xf32, #tpu.memory_space<vmem>>, vector<32x1xf32>
    %4 = vector.broadcast %3 : vector<32x1xf32> to vector<32x128xf32>
    %5 = arith.addf %2, %4 : vector<32x128xf32>
    %6 = math.absf %5 : vector<32x128xf32>
    %cst_5 = arith.constant 0.707106769 : f32
    %7 = vector.broadcast %cst_5 : f32 to vector<32x128xf32>
    %8 = arith.mulf %6, %7 : vector<32x128xf32>
    %cst_6 = arith.constant 0.327591091 : f32
    %9 = vector.broadcast %cst_6 : f32 to vector<32x128xf32>
    %10 = arith.mulf %9, %8 : vector<32x128xf32>
    %cst_7 = arith.constant 1.000000e+00 : f32
    %11 = vector.broadcast %cst_7 : f32 to vector<32x128xf32>
    %12 = arith.addf %11, %10 : vector<32x128xf32>
    %13 = tpu.reciprocal %12 {approx = true} : vector<32x128xf32> -> vector<32x128xf32>
    %cst_8 = arith.constant 1.06140542 : f32
    %14 = vector.broadcast %cst_8 : f32 to vector<32x128xf32>
    %15 = arith.mulf %14, %13 : vector<32x128xf32>
    %cst_9 = arith.constant -1.45315206 : f32
    %16 = vector.broadcast %cst_9 : f32 to vector<32x128xf32>
    %17 = arith.addf %15, %16 : vector<32x128xf32>
    %18 = arith.mulf %17, %13 : vector<32x128xf32>
    %cst_10 = arith.constant 1.42141378 : f32
    %19 = vector.broadcast %cst_10 : f32 to vector<32x128xf32>
    %20 = arith.addf %18, %19 : vector<32x128xf32>
    %21 = arith.mulf %20, %13 : vector<32x128xf32>
    %cst_11 = arith.constant -0.284496725 : f32
    %22 = vector.broadcast %cst_11 : f32 to vector<32x128xf32>
    %23 = arith.addf %21, %22 : vector<32x128xf32>
    %24 = arith.mulf %23, %13 : vector<32x128xf32>
    %cst_12 = arith.constant 0.254829586 : f32
    %25 = vector.broadcast %cst_12 : f32 to vector<32x128xf32>
    %26 = arith.addf %24, %25 : vector<32x128xf32>
    %27 = arith.mulf %26, %13 : vector<32x128xf32>
    %28 = arith.mulf %5, %5 : vector<32x128xf32>
    %cst_13 = arith.constant -5.000000e-01 : f32
    %29 = vector.broadcast %cst_13 : f32 to vector<32x128xf32>
    %30 = arith.mulf %29, %28 : vector<32x128xf32>
    %31 = math.exp %30 : vector<32x128xf32>
    %32 = arith.mulf %27, %31 : vector<32x128xf32>
    %cst_14 = arith.constant 1.000000e+00 : f32
    %33 = vector.broadcast %cst_14 : f32 to vector<32x128xf32>
    %34 = arith.subf %33, %32 : vector<32x128xf32>
    %35 = arith.mulf %6, %34 : vector<32x128xf32>
    %36 = arith.addf %5, %35 : vector<32x128xf32>
    %cst_15 = arith.constant 5.000000e-01 : f32
    %37 = vector.broadcast %cst_15 : f32 to vector<32x128xf32>
    %38 = arith.mulf %37, %36 : vector<32x128xf32>
    %c0_16 = arith.constant 0 : index
    %c0_17 = arith.constant 0 : index
    %39 = vector.load %arg4[%c0_16, %c0_17] : memref<32x32xf32, #tpu.memory_space<vmem>>, vector<32x32xf32>
    %cst_18 = arith.constant dense<0.000000e+00> : vector<32x128xf32>
    %40 = tpu.matmul %39, %38, %cst_18 {dimension_numbers = #tpu.dot_dimension_numbers<[1], [0], [0], [1], [0, 0, 1, 1], [], []>} : vector<32x32xf32>, vector<32x128xf32>, vector<32x128xf32> -> vector<32x128xf32>
    %c0_19 = arith.constant 0 : index
    %c0_20 = arith.constant 0 : index
    %41 = vector.load %arg5[%c0_19, %c0_20] : memref<32x1xf32, #tpu.memory_space<vmem>>, vector<32x1xf32>
    %42 = vector.broadcast %41 : vector<32x1xf32> to vector<32x128xf32>
    %43 = arith.addf %40, %42 : vector<32x128xf32>
    %44 = math.absf %43 : vector<32x128xf32>
    %cst_21 = arith.constant 0.707106769 : f32
    %45 = vector.broadcast %cst_21 : f32 to vector<32x128xf32>
    %46 = arith.mulf %44, %45 : vector<32x128xf32>
    %cst_22 = arith.constant 0.327591091 : f32
    %47 = vector.broadcast %cst_22 : f32 to vector<32x128xf32>
    %48 = arith.mulf %47, %46 : vector<32x128xf32>
    %cst_23 = arith.constant 1.000000e+00 : f32
    %49 = vector.broadcast %cst_23 : f32 to vector<32x128xf32>
    %50 = arith.addf %49, %48 : vector<32x128xf32>
    %51 = tpu.reciprocal %50 {approx = true} : vector<32x128xf32> -> vector<32x128xf32>
    %cst_24 = arith.constant 1.06140542 : f32
    %52 = vector.broadcast %cst_24 : f32 to vector<32x128xf32>
    %53 = arith.mulf %52, %51 : vector<32x128xf32>
    %cst_25 = arith.constant -1.45315206 : f32
    %54 = vector.broadcast %cst_25 : f32 to vector<32x128xf32>
    %55 = arith.addf %53, %54 : vector<32x128xf32>
    %56 = arith.mulf %55, %51 : vector<32x128xf32>
    %cst_26 = arith.constant 1.42141378 : f32
    %57 = vector.broadcast %cst_26 : f32 to vector<32x128xf32>
    %58 = arith.addf %56, %57 : vector<32x128xf32>
    %59 = arith.mulf %58, %51 : vector<32x128xf32>
    %cst_27 = arith.constant -0.284496725 : f32
    %60 = vector.broadcast %cst_27 : f32 to vector<32x128xf32>
    %61 = arith.addf %59, %60 : vector<32x128xf32>
    %62 = arith.mulf %61, %51 : vector<32x128xf32>
    %cst_28 = arith.constant 0.254829586 : f32
    %63 = vector.broadcast %cst_28 : f32 to vector<32x128xf32>
    %64 = arith.addf %62, %63 : vector<32x128xf32>
    %65 = arith.mulf %64, %51 : vector<32x128xf32>
    %66 = arith.mulf %43, %43 : vector<32x128xf32>
    %cst_29 = arith.constant -5.000000e-01 : f32
    %67 = vector.broadcast %cst_29 : f32 to vector<32x128xf32>
    %68 = arith.mulf %67, %66 : vector<32x128xf32>
    %69 = math.exp %68 : vector<32x128xf32>
    %70 = arith.mulf %65, %69 : vector<32x128xf32>
    %cst_30 = arith.constant 1.000000e+00 : f32
    %71 = vector.broadcast %cst_30 : f32 to vector<32x128xf32>
    %72 = arith.subf %71, %70 : vector<32x128xf32>
    %73 = arith.mulf %44, %72 : vector<32x128xf32>
    %74 = arith.addf %43, %73 : vector<32x128xf32>
    %cst_31 = arith.constant 5.000000e-01 : f32
    %75 = vector.broadcast %cst_31 : f32 to vector<32x128xf32>
    %76 = arith.mulf %75, %74 : vector<32x128xf32>
    %77 = arith.addf %76, %38 : vector<32x128xf32>
    %c0_32 = arith.constant 0 : index
    %c0_33 = arith.constant 0 : index
    %78 = vector.load %arg6[%c0_32, %c0_33] : memref<32x32xf32, #tpu.memory_space<vmem>>, vector<32x32xf32>
    %cst_34 = arith.constant dense<0.000000e+00> : vector<32x128xf32>
    %79 = tpu.matmul %78, %77, %cst_34 {dimension_numbers = #tpu.dot_dimension_numbers<[1], [0], [0], [1], [0, 0, 1, 1], [], []>} : vector<32x32xf32>, vector<32x128xf32>, vector<32x128xf32> -> vector<32x128xf32>
    %c0_35 = arith.constant 0 : index
    %c0_36 = arith.constant 0 : index
    %80 = vector.load %arg7[%c0_35, %c0_36] : memref<32x1xf32, #tpu.memory_space<vmem>>, vector<32x1xf32>
    %81 = vector.broadcast %80 : vector<32x1xf32> to vector<32x128xf32>
    %82 = arith.addf %79, %81 : vector<32x128xf32>
    %83 = math.absf %82 : vector<32x128xf32>
    %cst_37 = arith.constant 0.707106769 : f32
    %84 = vector.broadcast %cst_37 : f32 to vector<32x128xf32>
    %85 = arith.mulf %83, %84 : vector<32x128xf32>
    %cst_38 = arith.constant 0.327591091 : f32
    %86 = vector.broadcast %cst_38 : f32 to vector<32x128xf32>
    %87 = arith.mulf %86, %85 : vector<32x128xf32>
    %cst_39 = arith.constant 1.000000e+00 : f32
    %88 = vector.broadcast %cst_39 : f32 to vector<32x128xf32>
    %89 = arith.addf %88, %87 : vector<32x128xf32>
    %90 = tpu.reciprocal %89 {approx = true} : vector<32x128xf32> -> vector<32x128xf32>
    %cst_40 = arith.constant 1.06140542 : f32
    %91 = vector.broadcast %cst_40 : f32 to vector<32x128xf32>
    %92 = arith.mulf %91, %90 : vector<32x128xf32>
    %cst_41 = arith.constant -1.45315206 : f32
    %93 = vector.broadcast %cst_41 : f32 to vector<32x128xf32>
    %94 = arith.addf %92, %93 : vector<32x128xf32>
    %95 = arith.mulf %94, %90 : vector<32x128xf32>
    %cst_42 = arith.constant 1.42141378 : f32
    %96 = vector.broadcast %cst_42 : f32 to vector<32x128xf32>
    %97 = arith.addf %95, %96 : vector<32x128xf32>
    %98 = arith.mulf %97, %90 : vector<32x128xf32>
    %cst_43 = arith.constant -0.284496725 : f32
    %99 = vector.broadcast %cst_43 : f32 to vector<32x128xf32>
    %100 = arith.addf %98, %99 : vector<32x128xf32>
    %101 = arith.mulf %100, %90 : vector<32x128xf32>
    %cst_44 = arith.constant 0.254829586 : f32
    %102 = vector.broadcast %cst_44 : f32 to vector<32x128xf32>
    %103 = arith.addf %101, %102 : vector<32x128xf32>
    %104 = arith.mulf %103, %90 : vector<32x128xf32>
    %105 = arith.mulf %82, %82 : vector<32x128xf32>
    %cst_45 = arith.constant -5.000000e-01 : f32
    %106 = vector.broadcast %cst_45 : f32 to vector<32x128xf32>
    %107 = arith.mulf %106, %105 : vector<32x128xf32>
    %108 = math.exp %107 : vector<32x128xf32>
    %109 = arith.mulf %104, %108 : vector<32x128xf32>
    %cst_46 = arith.constant 1.000000e+00 : f32
    %110 = vector.broadcast %cst_46 : f32 to vector<32x128xf32>
    %111 = arith.subf %110, %109 : vector<32x128xf32>
    %112 = arith.mulf %83, %111 : vector<32x128xf32>
    %113 = arith.addf %82, %112 : vector<32x128xf32>
    %cst_47 = arith.constant 5.000000e-01 : f32
    %114 = vector.broadcast %cst_47 : f32 to vector<32x128xf32>
    %115 = arith.mulf %114, %113 : vector<32x128xf32>
    %116 = arith.addf %115, %77 : vector<32x128xf32>
    %c0_48 = arith.constant 0 : index
    %c0_49 = arith.constant 0 : index
    %117 = vector.load %arg8[%c0_48, %c0_49] : memref<16x32xf32, #tpu.memory_space<vmem>>, vector<16x32xf32>
    %cst_50 = arith.constant dense<0.000000e+00> : vector<16x128xf32>
    %118 = tpu.matmul %117, %116, %cst_50 {dimension_numbers = #tpu.dot_dimension_numbers<[1], [0], [0], [1], [0, 0, 1, 1], [], []>} : vector<16x32xf32>, vector<32x128xf32>, vector<16x128xf32> -> vector<16x128xf32>
    %c0_51 = arith.constant 0 : index
    %c0_52 = arith.constant 0 : index
    %119 = vector.load %arg9[%c0_51, %c0_52] : memref<16x1xf32, #tpu.memory_space<vmem>>, vector<16x1xf32>
    %120 = vector.broadcast %119 : vector<16x1xf32> to vector<16x128xf32>
    %121 = arith.addf %118, %120 : vector<16x128xf32>
    %c0_53 = arith.constant 0 : index
    %c0_54 = arith.constant 0 : index
    %122 = vector.load %arg10[%c0_53, %c0_54] : memref<16x128xf32, #tpu.memory_space<vmem>>, vector<16x128xf32>
    tpu.vector_store %arg10[%c0_53, %c0_54], %121 {strides = array<i32>} : memref<16x128xf32, #tpu.memory_space<vmem>>, vector<16x128xf32>,
    return
  }
  func.func @transform_0(%arg0: i32) -> (i32, i32) {
    %c0_i32 = arith.constant 0 : i32
    %c0_i32_0 = arith.constant 0 : i32
    return %c0_i32, %arg0 : i32, i32
  }
  func.func @transform_1(%arg0: i32) -> (i32, i32) {
    %c0_i32 = arith.constant 0 : i32
    %c0_i32_0 = arith.constant 0 : i32
    %c0_i32_1 = arith.constant 0 : i32
    return %c0_i32, %c0_i32_0 : i32, i32
  }
  func.func @transform_2(%arg0: i32) -> (i32, i32) {
    %c0_i32 = arith.constant 0 : i32
    %c0_i32_0 = arith.constant 0 : i32
    %c0_i32_1 = arith.constant 0 : i32
    return %c0_i32, %c0_i32_0 : i32, i32
  }
  func.func @transform_3(%arg0: i32) -> (i32, i32) {
    %c0_i32 = arith.constant 0 : i32
    %c0_i32_0 = arith.constant 0 : i32
    %c0_i32_1 = arith.constant 0 : i32
    return %c0_i32, %c0_i32_0 : i32, i32
  }
  func.func @transform_4(%arg0: i32) -> (i32, i32) {
    %c0_i32 = arith.constant 0 : i32
    %c0_i32_0 = arith.constant 0 : i32
    %c0_i32_1 = arith.constant 0 : i32
    return %c0_i32, %c0_i32_0 : i32, i32
  }
  func.func @transform_5(%arg0: i32) -> (i32, i32) {
    %c0_i32 = arith.constant 0 : i32
    %c0_i32_0 = arith.constant 0 : i32
    %c0_i32_1 = arith.constant 0 : i32
    return %c0_i32, %c0_i32_0 : i32, i32
  }
  func.func @transform_6(%arg0: i32) -> (i32, i32) {
    %c0_i32 = arith.constant 0 : i32
    %c0_i32_0 = arith.constant 0 : i32
    %c0_i32_1 = arith.constant 0 : i32
    return %c0_i32, %c0_i32_0 : i32, i32
  }
  func.func @transform_7(%arg0: i32) -> (i32, i32) {
    %c0_i32 = arith.constant 0 : i32
    %c0_i32_0 = arith.constant 0 : i32
    %c0_i32_1 = arith.constant 0 : i32
    return %c0_i32, %c0_i32_0 : i32, i32
  }
  func.func @transform_8(%arg0: i32) -> (i32, i32) {
    %c0_i32 = arith.constant 0 : i32
    %c0_i32_0 = arith.constant 0 : i32
    %c0_i32_1 = arith.constant 0 : i32
    return %c0_i32, %c0_i32_0 : i32, i32
  }
  func.func @transform_9(%arg0: i32) -> (i32, i32) {
    %c0_i32 = arith.constant 0 : i32
    %c0_i32_0 = arith.constant 0 : i32
    return %c0_i32, %arg0 : i32, i32
  }
}

</mosaic_0001>

<bundles_post_ra>
// kernel: tpu_custom_call.1
= control target key start
LH: loop header
LB: loop body
LE: loop exit
PB: predicated region body
PF: predicated region fallthrough
CT: control target
= control target key end

     0   :  { %vm62_vm0 = vcmask 64512   ;;  %v685_v3 = vmov 0   ;;  %s1016_s0 = inlined_call_operand.vmem [shape: f32[8,128], index: 0, kind: input, shape index: {}]   ;;  %s1017_s1 = inlined_call_operand.vmem [shape: f32[32,8], index: 1, kind: input, shape index: {}]   ;;  %s1018_s2 = inlined_call_operand.vmem [shape: f32[32,1], index: 2, kind: input, shape index: {}]   ;;  %s1019_s3 = inlined_call_operand.vmem [shape: f32[32,32], index: 3, kind: input, shape index: {}]   ;;  %s1020_s4 = inlined_call_operand.vmem [shape: f32[32,1], index: 4, kind: input, shape index: {}]   ;;  %s1021_s5 = inlined_call_operand.vmem [shape: f32[32,32], index: 5, kind: input, shape index: {}]   ;;  %s1022_s6 = inlined_call_operand.vmem [shape: f32[32,1], index: 6, kind: input, shape index: {}]   ;;  %s1023_s7 = inlined_call_operand.vmem [shape: f32[16,32], index: 7, kind: input, shape index: {}]   ;;  %s1024_s8 = inlined_call_operand.vmem [shape: f32[16,1], index: 8, kind: input, shape index: {}]   ;;  %s1025_s9 = inlined_call_operand.hbm [shape: f32[16,128], index: 9, kind: output, shape index: {}]  }
   0x1   :  { %v33_v0 = vld [vmem:[%s1016_s0] sm:$0xff]  ;;  %v41_v1 = vld [vmem:[%s1018_s2 + $0x18] sm:$0xff]  ;;  %608 = vset.pattern.permute.xlu0 %v685_v3  ;;  %v39_v4 = vld [vmem:[%s1018_s2 + $0x8] sm:$0xff]  ;;  %609 = vset.pattern.permute.xlu1 %v685_v3 }
   0x2   :  { %v34_v2 = vld [vmem:[%s1017_s1] sm:$0xff]  ;;  %90 = vmatpush.msra.mxu0 %v33_v0  ;;  %59 = vperm.xlu0 %608, %v41_v1  }
   0x3   :  { %590 = vmatmul.msk.f32.vlgmr.msra.gmra.mxu0 %vm62_vm0, %v34_v2  ;;  %49 = vperm.xlu1 %609, %v39_v4  }
   0x4   :  { %610 = vset.pattern.permute.xlu2 %v685_v3 }
   0x5   :  { %14 = vsyncpa [#allocation3], 0  ;;  %v40_v5 = vld [vmem:[%s1018_s2 + $0x10] sm:$0xff]  ;;  %v35_v6 = vld [vmem:[%s1017_s1 + $0x8] sm:$0xff]  ;;  %vm224_vm1 = vcmask 261120   ;;  %s686_s15 = smov [#allocation2]  }
   0x6   :  { %v38_v7 = vld [vmem:[%s1018_s2] sm:$0xff]  ;;  %v201_v8 = vld [vmem:[%s1020_s4 + $0x8] sm:$0xff]  ;;  %v36_v9 = vld [vmem:[%s1017_s1 + $0x10] sm:$0xff]  ;;  %s578_s0 = sshll.u32 %s1025_s9, 4  ;;  %s687_s17 = smov 128   ;;  %s579_s0 = int_to_ptr.hbm [resolvable:$true] %s578_s0 }
   0x7   :  { %v200_v10 = vld [vmem:[%s1020_s4] sm:$0xff]  ;;  %v368_v11 = vld [vmem:[%s1022_s6 + $0x10] sm:$0xff]  ;;  %v37_v12 = vld [vmem:[%s1017_s1 + $0x18] sm:$0xff]  ;;  %s576_s1 = sshll.u32 %s686_s15, 4  ;;  %s577_s1 = int_to_ptr.vmem [resolvable:$true] %s576_s1 }
   0x8   :  { %v367_v13 = vld [vmem:[%s1022_s6 + $0x8] sm:$0xff]  ;;  %v529_v14 = vld [vmem:[%s1024_s8] sm:$0xff] }
   0x9   :  { %v530_v15 = vld [vmem:[%s1024_s8 + $0x8] sm:$0xff] }
   0xa   :  { %54 = vperm.xlu0 %608, %v40_v5  }
   0xb   :  { %591 = vmatmul.msk.f32.gmra.mxu0 %vm62_vm0, %v35_v6  ;;  %44 = vperm.xlu1 %609, %v38_v7  }
  0x12   :  { %211 = vperm.xlu0 %608, %v201_v8  }
  0x13   :  { %592 = vmatmul.msk.f32.gmra.mxu0 %vm62_vm0, %v36_v9  ;;  %206 = vperm.xlu1 %609, %v200_v10  }
  0x1a   :  { %382 = vperm.xlu0 %608, %v368_v11  }
  0x1b   :  { %593 = vmatmul.msk.f32.gmra.mxu0 %vm62_vm0, %v37_v12  ;;  %377 = vperm.xlu1 %609, %v367_v13  }
  0x22   :  { %533 = vperm.xlu0 %608, %v529_v14  }
  0x23   :  { %538 = vperm.xlu1 %609, %v530_v15  }
  0x74   :  { %v60_v22 = vpop.permute.xlu0 %59 }
  0x75   :  { %v50_v16 = vpop.permute.xlu1 %49 }
  0x7c   :  { %v55_v30 = vpop.permute.xlu0 %54 }
  0x7d   :  { %v45_v17 = vpop.permute.xlu1 %44 }
  0x80   :  { %v92_v18 = vpop.f32.mrf.mxu0 }
  0x81   :  { %v788_v19 = vadd.f32 %v92_v18, %v45_v17 }
  0x83   :  { %v104_v20 = vand.u32 2147483647, %v788_v19  ;;  %v160_v62 = vmul.f32 %v788_v19, %v788_v19 }
  0x85   :  { %v108_v21 = vmul.f32 0.70710677, %v104_v20  ;;  %v164_v8 = vmul.f32 -0.5, %v160_v62  ;;  %v366_v62 = vld [vmem:[%s1022_s6] sm:$0xff] }
  0x87   :  { %v112_v23 = vmul.f32 0.3275911, %v108_v21  ;;  %v168_v18 = vmul.f32 1.442695, %v164_v8 }
  0x88   :  { %v95_v24 = vpop.f32.mrf.mxu0 }
  0x89   :  { %v116_v25 = vadd.f32 1.0, %v112_v23  ;;  %v793_v26 = vadd.f32 %v95_v24, %v50_v16 }
  0x8b   :  { %v105_v27 = vand.u32 2147483647, %v793_v26  ;;  %611 = vrcp.f32 %v116_v25  ;;  %v161_v59 = vmul.f32 %v793_v26, %v793_v26 }
  0x8d   :  { %v109_v28 = vmul.f32 0.70710677, %v105_v27  ;;  %v165_v3 = vmul.f32 -0.5, %v161_v59 }
  0x8f   :  { %v113_v29 = vmul.f32 0.3275911, %v109_v28  ;;  %v170_v13 = vmul.f32 1.442695, %v165_v3 }
  0x90   :  { %v98_v31 = vpop.f32.mrf.mxu0 }
  0x91   :  { %v117_v32 = vadd.f32 1.0, %v113_v29  ;;  %v798_v33 = vadd.f32 %v98_v31, %v55_v30  ;;  %v800_v34 = vpop.eup %611 }
  0x92   :  { %v124_v37 = vmul.f32 1.0614054, %v800_v34 }
  0x93   :  { %613 = vrcp.f32 %v117_v32  ;;  %v106_v35 = vand.u32 2147483647, %v798_v33  ;;  %v162_v56 = vmul.f32 %v798_v33, %v798_v33 }
  0x94   :  { %v128_v44 = vadd.f32 -1.4531521, %v124_v37 }
  0x95   :  { %v110_v36 = vmul.f32 0.70710677, %v106_v35  ;;  %v166_v63 = vmul.f32 -0.5, %v162_v56 }
  0x96   :  { %v132_v49 = vmul.f32 %v800_v34, %v128_v44 }
  0x97   :  { %v114_v38 = vmul.f32 0.3275911, %v110_v36  ;;  %v172_v9 = vmul.f32 1.442695, %v166_v63  ;;  %v199_v63 = vld [vmem:[%s1019_s3 + $0x18] sm:$0xff] }
  0x98   :  { %v101_v39 = vpop.f32.mrf.mxu0  ;;  %v136_v55 = vadd.f32 1.4214138, %v132_v49 }
  0x99   :  { %v614_v40 = vpop.eup %613  ;;  %v118_v41 = vadd.f32 1.0, %v114_v38  ;;  %v806_v42 = vadd.f32 %v101_v39, %v60_v22 }
  0x9a   :  { %v125_v43 = vmul.f32 1.0614054, %v614_v40  ;;  %v140_v61 = vmul.f32 %v800_v34, %v136_v55 }
  0x9b   :  { %615 = vrcp.f32 %v118_v41  ;;  %v107_v45 = vand.u32 2147483647, %v806_v42  ;;  %v163_v4 = vmul.f32 %v806_v42, %v806_v42 }
  0x9c   :  { %v129_v46 = vadd.f32 -1.4531521, %v125_v43  ;;  %v144_v7 = vadd.f32 -0.28449672, %v140_v61  ;;  %v198_v61 = vld [vmem:[%s1019_s3 + $0x10] sm:$0xff] }
  0x9d   :  { %v111_v47 = vmul.f32 0.70710677, %v107_v45  ;;  %v167_v14 = vmul.f32 -0.5, %v163_v4 }
  0x9e   :  { %v133_v48 = vmul.f32 %v614_v40, %v129_v46  ;;  %v148_v17 = vmul.f32 %v800_v34, %v144_v7  ;;  %v212_v7 = vpop.permute.xlu0 %211 }
  0x9f   :  { %v115_v50 = vmul.f32 0.3275911, %v111_v47  ;;  %v174_v24 = vmul.f32 1.442695, %v167_v14 }
  0xa0   :  { %v137_v51 = vadd.f32 1.4214138, %v133_v48  ;;  %v152_v29 = vadd.f32 0.2548296, %v148_v17 }
  0xa1   :  { %v616_v52 = vpop.eup %615  ;;  %v119_v53 = vadd.f32 1.0, %v115_v50 }
  0xa2   :  { %v126_v54 = vmul.f32 1.0614054, %v616_v52  ;;  %v141_v58 = vmul.f32 %v614_v40, %v137_v51  ;;  %v156_v38 = vmul.f32 %v800_v34, %v152_v29 }
  0xa3   :  { %617 = vrcp.f32 %v119_v53 }
  0xa4   :  { %v130_v57 = vadd.f32 -1.4531521, %v126_v54  ;;  %v145_v1 = vadd.f32 -0.28449672, %v141_v58  ;;  %619 = vpow2.f32 %v172_v9 }
  0xa5   :  { %621 = vpow2.f32 %v170_v13 }
  0xa6   :  { %v134_v60 = vmul.f32 %v616_v52, %v130_v57  ;;  %v149_v12 = vmul.f32 %v614_v40, %v145_v1  ;;  %623 = vpow2.f32 %v168_v18 }
  0xa7   :  { %625 = vpow2.f32 %v174_v24 }
  0xa8   :  { %v138_v0 = vadd.f32 1.4214138, %v134_v60  ;;  %v153_v23 = vadd.f32 0.2548296, %v149_v12  ;;  %v369_v60 = vld [vmem:[%s1022_s6 + $0x18] sm:$0xff] }
  0xa9   :  { %v618_v2 = vpop.eup %617 }
  0xaa   :  { %v127_v5 = vmul.f32 1.0614054, %v618_v2  ;;  %v142_v6 = vmul.f32 %v616_v52, %v138_v0  ;;  %v157_v31 = vmul.f32 %v614_v40, %v153_v23  ;;  %v620_v32 = vpop.eup %619  ;;  %v207_v0 = vpop.permute.xlu1 %206 }
  0xab   :  { %v622_v39 = vpop.eup %621 }
  0xac   :  { %v131_v10 = vadd.f32 -1.4531521, %v127_v5  ;;  %v146_v11 = vadd.f32 -0.28449672, %v142_v6  ;;  %v177_v43 = vmul.f32 %v622_v39, %v157_v31  ;;  %v624_v44 = vpop.eup %623 }
  0xad   :  { %v176_v48 = vmul.f32 %v624_v44, %v156_v38  ;;  %v626_v49 = vpop.eup %625 }
  0xae   :  { %v135_v15 = vmul.f32 %v618_v2, %v131_v10  ;;  %v150_v16 = vmul.f32 %v616_v52, %v146_v11  ;;  %v181_v51 = vsub.f32 1.0, %v177_v43 }
  0xaf   :  { %v180_v53 = vsub.f32 1.0, %v176_v48 }
  0xb0   :  { %v139_v21 = vadd.f32 1.4214138, %v135_v15  ;;  %v154_v22 = vadd.f32 0.2548296, %v150_v16  ;;  %v185_v34 = vmul.f32 %v181_v51, %v105_v27 }
  0xb1   :  { %v184_v57 = vmul.f32 %v180_v53, %v104_v20 }
  0xb2   :  { %v143_v25 = vmul.f32 %v618_v2, %v139_v21  ;;  %v158_v28 = vmul.f32 %v616_v52, %v154_v22  ;;  %v189_v59 = vadd.f32 %v185_v34, %v793_v26  ;;  %v196_v26 = vld [vmem:[%s1019_s3] sm:$0xff] }
  0xb3   :  { %v188_v27 = vadd.f32 %v184_v57, %v788_v19  ;;  %v197_v19 = vld [vmem:[%s1019_s3 + $0x8] sm:$0xff] }
  0xb4   :  { %v147_v30 = vadd.f32 -0.28449672, %v143_v25  ;;  %v178_v37 = vmul.f32 %v620_v32, %v158_v28 }
  0xb5   :  { %v847_v20 = vmul.f32 0.5, %v188_v27 }
  0xb6   :  { %v151_v36 = vmul.f32 %v618_v2, %v147_v30  ;;  %v182_v47 = vsub.f32 1.0, %v178_v37 }
  0xb8   :  { %v155_v41 = vadd.f32 0.2548296, %v151_v36  ;;  %v186_v40 = vmul.f32 %v182_v47, %v106_v35  ;;  %v203_v35 = vld [vmem:[%s1020_s4 + $0x18] sm:$0xff] }
  0xb9   :  { %221 = vperm.xlu2 %610, %v203_v35  }
  0xba   :  { %v159_v46 = vmul.f32 %v618_v2, %v155_v41  ;;  %v190_v56 = vadd.f32 %v186_v40, %v798_v33  ;;  %v844_v33 = vmul.f32 0.5, %v189_v59 }
  0xbc   :  { %v179_v50 = vmul.f32 %v626_v49, %v159_v46 }
  0xbe   :  { %v183_v52 = vsub.f32 1.0, %v179_v50 }
  0xc0   :  { %v187_v54 = vmul.f32 %v183_v52, %v107_v45  ;;  %v840_v45 = vmul.f32 0.5, %v190_v56 }
  0xc2   :  { %v191_v55 = vadd.f32 %v187_v54, %v806_v42  ;;  %v202_v42 = vld [vmem:[%s1020_s4 + $0x10] sm:$0xff] }
  0xc3   :  { %216 = vperm.xlu2 %610, %v202_v42  }
  0xc4   :  { %v833_v58 = vmul.f32 0.5, %v191_v55 }
  0xc6   :  { %249 = vmatpush.msra.mxu1 %v833_v58 }
  0xc8   :  { %250 = vmatpush.msra.mxu1 %v840_v45 }
  0xca   :  { %251 = vmatpush.msra.mxu1 %v844_v33 }
  0xcb   :  { %387 = vperm.xlu2 %610, %v369_v60  }
  0xcc   :  { %252 = vmatpush.msra.mxu1 %v847_v20 }
  0xcd   :  { %594 = vmatmul.msk.f32.vlgmr.msra.gmra.mxu1 %vm224_vm1, %v196_v26 }
  0xd3   :  { %372 = vperm.xlu2 %610, %v366_v62  }
  0xd5   :  { %595 = vmatmul.msk.f32.gmra.mxu1 %vm224_vm1, %v197_v19 }
  0xdd   :  { %596 = vmatmul.msk.f32.gmra.mxu1 %vm224_vm1, %v198_v61 }
  0xe5   :  { %597 = vmatmul.msk.f32.gmra.mxu1 %vm224_vm1, %v199_v63 }
 0x113   :  { %v222_v5 = vpop.permute.xlu2 %221 }
 0x11d   :  { %v217_v14 = vpop.permute.xlu2 %216 }
 0x14a   :  { %v254_v1 = vpop.f32.mrf.mxu1 }
 0x14b   :  { %v875_v2 = vadd.f32 %v254_v1, %v207_v0 }
 0x14d   :  { %v266_v3 = vand.u32 2147483647, %v875_v2  ;;  %v322_v54 = vmul.f32 %v875_v2, %v875_v2 }
 0x14f   :  { %v270_v4 = vmul.f32 0.70710677, %v266_v3  ;;  %v326_v26 = vmul.f32 -0.5, %v322_v54 }
 0x151   :  { %v274_v6 = vmul.f32 0.3275911, %v270_v4 }
 0x152   :  { %v257_v8 = vpop.f32.mrf.mxu1 }
 0x153   :  { %v278_v9 = vadd.f32 1.0, %v274_v6  ;;  %v880_v10 = vadd.f32 %v257_v8, %v212_v7 }
 0x155   :  { %627 = vrcp.f32 %v278_v9  ;;  %v267_v11 = vand.u32 2147483647, %v880_v10  ;;  %v323_v52 = vmul.f32 %v880_v10, %v880_v10 }
 0x157   :  { %v271_v12 = vmul.f32 0.70710677, %v267_v11  ;;  %v327_v57 = vmul.f32 -0.5, %v323_v52 }
 0x159   :  { %v275_v13 = vmul.f32 0.3275911, %v271_v12  ;;  %v332_v63 = vmul.f32 1.442695, %v327_v57 }
 0x15a   :  { %v260_v15 = vpop.f32.mrf.mxu1 }
 0x15b   :  { %v885_v16 = vpop.eup %627  ;;  %v279_v17 = vadd.f32 1.0, %v275_v13  ;;  %v887_v18 = vadd.f32 %v260_v15, %v217_v14 }
 0x15c   :  { %v286_v22 = vmul.f32 1.0614054, %v885_v16 }
 0x15d   :  { %629 = vrcp.f32 %v279_v17  ;;  %v268_v21 = vand.u32 2147483647, %v887_v18  ;;  %v324_v48 = vmul.f32 %v887_v18, %v887_v18 }
 0x15e   :  { %v290_v28 = vadd.f32 -1.4531521, %v286_v22 }
 0x15f   :  { %v272_v23 = vmul.f32 0.70710677, %v268_v21  ;;  %v328_v34 = vmul.f32 -0.5, %v324_v48 }
 0x160   :  { %v294_v38 = vmul.f32 %v885_v16, %v290_v28 }
 0x161   :  { %v276_v24 = vmul.f32 0.3275911, %v272_v23  ;;  %v334_v42 = vmul.f32 1.442695, %v328_v34 }
 0x162   :  { %v263_v25 = vpop.f32.mrf.mxu1  ;;  %v298_v46 = vadd.f32 1.4214138, %v294_v38 }
 0x163   :  { %v630_v29 = vpop.eup %629  ;;  %v280_v30 = vadd.f32 1.0, %v276_v24  ;;  %v893_v31 = vadd.f32 %v263_v25, %v222_v5  ;;  %v330_v5 = vmul.f32 1.442695, %v326_v26 }
 0x164   :  { %v287_v32 = vmul.f32 1.0614054, %v630_v29  ;;  %v302_v53 = vmul.f32 %v885_v16, %v298_v46 }
 0x165   :  { %631 = vrcp.f32 %v280_v30  ;;  %v269_v36 = vand.u32 2147483647, %v893_v31  ;;  %v325_v19 = vmul.f32 %v893_v31, %v893_v31 }
 0x166   :  { %v291_v37 = vadd.f32 -1.4531521, %v287_v32  ;;  %v306_v35 = vadd.f32 -0.28449672, %v302_v53 }
 0x167   :  { %v273_v39 = vmul.f32 0.70710677, %v269_v36  ;;  %v329_v6 = vmul.f32 -0.5, %v325_v19  ;;  %v378_v19 = vpop.permute.xlu1 %377 }
 0x168   :  { %v295_v41 = vmul.f32 %v630_v29, %v291_v37  ;;  %v310_v4 = vmul.f32 %v885_v16, %v306_v35 }
 0x169   :  { %v277_v43 = vmul.f32 0.3275911, %v273_v39  ;;  %v336_v15 = vmul.f32 1.442695, %v329_v6 }
 0x16a   :  { %v299_v44 = vadd.f32 1.4214138, %v295_v41  ;;  %v314_v14 = vadd.f32 0.2548296, %v310_v4  ;;  %v383_v4 = vpop.permute.xlu0 %382 }
 0x16b   :  { %v632_v47 = vpop.eup %631  ;;  %v281_v49 = vadd.f32 1.0, %v277_v43 }
 0x16c   :  { %v288_v50 = vmul.f32 1.0614054, %v632_v47  ;;  %v303_v51 = vmul.f32 %v630_v29, %v299_v44  ;;  %v318_v30 = vmul.f32 %v885_v16, %v314_v14 }
 0x16d   :  { %633 = vrcp.f32 %v281_v49 }
 0x16e   :  { %v292_v40 = vadd.f32 -1.4531521, %v288_v50  ;;  %v307_v56 = vadd.f32 -0.28449672, %v303_v51  ;;  %635 = vpow2.f32 %v334_v42 }
 0x16f   :  { %637 = vpow2.f32 %v332_v63 }
 0x170   :  { %v296_v55 = vmul.f32 %v632_v47, %v292_v40  ;;  %v311_v62 = vmul.f32 %v630_v29, %v307_v56  ;;  %639 = vpow2.f32 %v330_v5 }
 0x171   :  { %641 = vpow2.f32 %v336_v15 }
 0x172   :  { %v300_v59 = vadd.f32 1.4214138, %v296_v55  ;;  %v315_v9 = vadd.f32 0.2548296, %v311_v62 }
 0x173   :  { %v634_v27 = vpop.eup %633 }
 0x174   :  { %v289_v60 = vmul.f32 1.0614054, %v634_v27  ;;  %v304_v61 = vmul.f32 %v632_v47, %v300_v59  ;;  %v319_v23 = vmul.f32 %v630_v29, %v315_v9  ;;  %v636_v24 = vpop.eup %635 }
 0x175   :  { %v638_v32 = vpop.eup %637 }
 0x176   :  { %v293_v0 = vadd.f32 -1.4531521, %v289_v60  ;;  %v308_v1 = vadd.f32 -0.28449672, %v304_v61  ;;  %v339_v38 = vmul.f32 %v638_v32, %v319_v23  ;;  %v640_v39 = vpop.eup %639 }
 0x177   :  { %v338_v44 = vmul.f32 %v640_v39, %v318_v30  ;;  %v642_v49 = vpop.eup %641 }
 0x178   :  { %v297_v7 = vmul.f32 %v634_v27, %v293_v0  ;;  %v312_v8 = vmul.f32 %v632_v47, %v308_v1  ;;  %v343_v48 = vsub.f32 1.0, %v339_v38 }
 0x17a   :  { %v301_v12 = vadd.f32 1.4214138, %v297_v7  ;;  %v316_v13 = vadd.f32 0.2548296, %v312_v8  ;;  %v347_v16 = vmul.f32 %v343_v48, %v267_v11 }
 0x17c   :  { %v305_v17 = vmul.f32 %v634_v27, %v301_v12  ;;  %v320_v22 = vmul.f32 %v632_v47, %v316_v13  ;;  %v342_v47 = vsub.f32 1.0, %v338_v44  ;;  %v351_v34 = vadd.f32 %v347_v16, %v880_v10 }
 0x17e   :  { %v309_v25 = vadd.f32 -0.28449672, %v305_v17  ;;  %v340_v28 = vmul.f32 %v636_v24, %v320_v22  ;;  %v346_v53 = vmul.f32 %v342_v47, %v266_v3  ;;  %v355_v11 = vmul.f32 0.5, %v351_v34 }
 0x180   :  { %v313_v37 = vmul.f32 %v634_v27, %v309_v25  ;;  %v344_v43 = vsub.f32 1.0, %v340_v28  ;;  %v931_v3 = vadd.f32 %v355_v11, %v844_v33  ;;  %v364_v33 = vld [vmem:[%s1021_s5 + $0x10] sm:$0xff] }
 0x182   :  { %v317_v41 = vadd.f32 0.2548296, %v313_v37  ;;  %v348_v29 = vmul.f32 %v344_v43, %v268_v21  ;;  %v350_v21 = vadd.f32 %v346_v53, %v875_v2  ;;  %v388_v2 = vpop.permute.xlu2 %387 }
 0x184   :  { %v321_v46 = vmul.f32 %v634_v27, %v317_v41  ;;  %v352_v40 = vadd.f32 %v348_v29, %v887_v18  ;;  %v354_v18 = vmul.f32 0.5, %v350_v21 }
 0x186   :  { %v341_v50 = vmul.f32 %v642_v49, %v321_v46  ;;  %v356_v56 = vmul.f32 0.5, %v352_v40  ;;  %v935_v10 = vadd.f32 %v354_v18, %v847_v20  ;;  %v365_v20 = vld [vmem:[%s1021_s5 + $0x18] sm:$0xff] }
 0x188   :  { %v345_v51 = vsub.f32 1.0, %v341_v50 }
 0x18a   :  { %v349_v52 = vmul.f32 %v345_v51, %v269_v36  ;;  %v927_v36 = vadd.f32 %v356_v56, %v840_v45  ;;  %v363_v45 = vld [vmem:[%s1021_s5 + $0x8] sm:$0xff] }
 0x18c   :  { %v353_v54 = vadd.f32 %v349_v52, %v893_v31  ;;  %v373_v31 = vpop.permute.xlu2 %372 }
 0x18e   :  { %v357_v55 = vmul.f32 0.5, %v353_v54 }
 0x190   :  { %v923_v57 = vadd.f32 %v357_v55, %v833_v58  ;;  %v362_v58 = vld [vmem:[%s1021_s5] sm:$0xff] }
 0x192   :  { %414 = vmatpush.msra.mxu2 %v923_v57 }
 0x194   :  { %415 = vmatpush.msra.mxu2 %v927_v36 }
 0x196   :  { %416 = vmatpush.msra.mxu2 %v931_v3 }
 0x198   :  { %417 = vmatpush.msra.mxu2 %v935_v10 }
 0x199   :  { %598 = vmatmul.msk.f32.vlgmr.msra.gmra.mxu2 %vm224_vm1, %v362_v58 }
 0x1a1   :  { %599 = vmatmul.msk.f32.gmra.mxu2 %vm224_vm1, %v363_v45 }
 0x1a9   :  { %600 = vmatmul.msk.f32.gmra.mxu2 %vm224_vm1, %v364_v33 }
 0x1b1   :  { %601 = vmatmul.msk.f32.gmra.mxu2 %vm224_vm1, %v365_v20 }
 0x21c   :  { %v419_v59 = vpop.f32.mrf.mxu2 }
 0x21d   :  { %v954_v35 = vadd.f32 %v419_v59, %v373_v31 }
 0x21f   :  { %v431_v27 = vand.u32 2147483647, %v954_v35  ;;  %v487_v16 = vmul.f32 %v954_v35, %v954_v35 }
 0x221   :  { %v435_v26 = vmul.f32 0.70710677, %v431_v27  ;;  %v491_v21 = vmul.f32 -0.5, %v487_v16 }
 0x223   :  { %v439_v42 = vmul.f32 0.3275911, %v435_v26  ;;  %v495_v26 = vmul.f32 1.442695, %v491_v21 }
 0x224   :  { %v422_v60 = vpop.f32.mrf.mxu2 }
 0x225   :  { %v443_v61 = vadd.f32 1.0, %v439_v42  ;;  %v959_v62 = vadd.f32 %v422_v60, %v378_v19 }
 0x227   :  { %643 = vrcp.f32 %v443_v61  ;;  %v432_v63 = vand.u32 2147483647, %v959_v62  ;;  %v488_v29 = vmul.f32 %v959_v62, %v959_v62 }
 0x229   :  { %v436_v0 = vmul.f32 0.70710677, %v432_v63  ;;  %v492_v54 = vmul.f32 -0.5, %v488_v29 }
 0x22b   :  { %v440_v1 = vmul.f32 0.3275911, %v436_v0  ;;  %v497_v20 = vmul.f32 1.442695, %v492_v54 }
 0x22c   :  { %v425_v5 = vpop.f32.mrf.mxu2 }
 0x22d   :  { %v964_v6 = vpop.eup %643  ;;  %v444_v7 = vadd.f32 1.0, %v440_v1  ;;  %v966_v8 = vadd.f32 %v425_v5, %v383_v4 }
 0x22e   :  { %v451_v12 = vmul.f32 1.0614054, %v964_v6 }
 0x22f   :  { %645 = vrcp.f32 %v444_v7  ;;  %v433_v9 = vand.u32 2147483647, %v966_v8  ;;  %v489_v46 = vmul.f32 %v966_v8, %v966_v8 }
 0x230   :  { %v455_v17 = vadd.f32 -1.4531521, %v451_v12 }
 0x231   :  { %v437_v13 = vmul.f32 0.70710677, %v433_v9  ;;  %v493_v52 = vmul.f32 -0.5, %v489_v46 }
 0x232   :  { %v459_v32 = vmul.f32 %v964_v6, %v455_v17 }
 0x233   :  { %v441_v14 = vmul.f32 0.3275911, %v437_v13  ;;  %v499_v11 = vmul.f32 1.442695, %v493_v52 }
 0x234   :  { %v428_v15 = vpop.f32.mrf.mxu2  ;;  %v463_v43 = vadd.f32 1.4214138, %v459_v32 }
 0x235   :  { %v646_v22 = vpop.eup %645  ;;  %v445_v23 = vadd.f32 1.0, %v441_v14  ;;  %v972_v24 = vadd.f32 %v428_v15, %v388_v2 }
 0x236   :  { %v452_v25 = vmul.f32 1.0614054, %v646_v22  ;;  %v467_v51 = vmul.f32 %v964_v6, %v463_v43 }
 0x237   :  { %647 = vrcp.f32 %v445_v23  ;;  %v434_v28 = vand.u32 2147483647, %v972_v24  ;;  %v490_v18 = vmul.f32 %v972_v24, %v972_v24 }
 0x238   :  { %v456_v30 = vadd.f32 -1.4531521, %v452_v25  ;;  %v471_v55 = vadd.f32 -0.28449672, %v467_v51 }
 0x239   :  { %v438_v37 = vmul.f32 0.70710677, %v434_v28  ;;  %v494_v42 = vmul.f32 -0.5, %v490_v18 }
 0x23a   :  { %v460_v38 = vmul.f32 %v646_v22, %v456_v30  ;;  %v475_v59 = vmul.f32 %v964_v6, %v471_v55 }
 0x23b   :  { %v442_v39 = vmul.f32 0.3275911, %v438_v37  ;;  %v501_v5 = vmul.f32 1.442695, %v494_v42 }
 0x23c   :  { %v464_v41 = vadd.f32 1.4214138, %v460_v38  ;;  %v479_v4 = vadd.f32 0.2548296, %v475_v59 }
 0x23d   :  { %v648_v44 = vpop.eup %647  ;;  %v446_v48 = vadd.f32 1.0, %v442_v39 }
 0x23e   :  { %v453_v49 = vmul.f32 1.0614054, %v648_v44  ;;  %v468_v50 = vmul.f32 %v646_v22, %v464_v41  ;;  %v483_v23 = vmul.f32 %v964_v6, %v479_v4 }
 0x23f   :  { %649 = vrcp.f32 %v446_v48 }
 0x240   :  { %v457_v47 = vadd.f32 -1.4531521, %v453_v49  ;;  %v472_v53 = vadd.f32 -0.28449672, %v468_v50  ;;  %651 = vpow2.f32 %v499_v11 }
 0x241   :  { %653 = vpow2.f32 %v497_v20 }
 0x242   :  { %v461_v40 = vmul.f32 %v648_v44, %v457_v47  ;;  %v476_v33 = vmul.f32 %v646_v22, %v472_v53  ;;  %655 = vpow2.f32 %v495_v26 }
 0x243   :  { %657 = vpow2.f32 %v501_v5 }
 0x244   :  { %v465_v34 = vadd.f32 1.4214138, %v461_v40  ;;  %v480_v61 = vadd.f32 0.2548296, %v476_v33 }
 0x245   :  { %v650_v56 = vpop.eup %649 }
 0x246   :  { %v454_v58 = vmul.f32 1.0614054, %v650_v56  ;;  %v469_v45 = vmul.f32 %v648_v44, %v465_v34  ;;  %v484_v13 = vmul.f32 %v646_v22, %v480_v61  ;;  %v652_v14 = vpop.eup %651 }
 0x247   :  { %v654_v25 = vpop.eup %653 }
 0x248   :  { %v458_v2 = vadd.f32 -1.4531521, %v454_v58  ;;  %v473_v31 = vadd.f32 -0.28449672, %v469_v45  ;;  %v504_v32 = vmul.f32 %v654_v25, %v484_v13  ;;  %v656_v37 = vpop.eup %655 }
 0x249   :  { %v503_v41 = vmul.f32 %v656_v37, %v483_v23  ;;  %v658_v48 = vpop.eup %657 }
 0x24a   :  { %v462_v19 = vmul.f32 %v650_v56, %v458_v2  ;;  %v477_v60 = vmul.f32 %v648_v44, %v473_v31  ;;  %v508_v46 = vsub.f32 1.0, %v504_v32 }
 0x24c   :  { %v466_v0 = vadd.f32 1.4214138, %v462_v19  ;;  %v481_v1 = vadd.f32 0.2548296, %v477_v60  ;;  %v512_v6 = vmul.f32 %v508_v46, %v432_v63 }
 0x24e   :  { %v470_v7 = vmul.f32 %v650_v56, %v466_v0  ;;  %v485_v12 = vmul.f32 %v648_v44, %v481_v1  ;;  %v507_v44 = vsub.f32 1.0, %v503_v41  ;;  %v516_v52 = vadd.f32 %v512_v6, %v959_v62  ;;  %v527_v62 = vld [vmem:[%s1023_s7] sm:$0xff] }
 0x250   :  { %v474_v15 = vadd.f32 -0.28449672, %v470_v7  ;;  %v505_v17 = vmul.f32 %v652_v14, %v485_v12  ;;  %v511_v51 = vmul.f32 %v507_v44, %v431_v27  ;;  %v520_v34 = vmul.f32 0.5, %v516_v52 }
 0x252   :  { %v478_v30 = vmul.f32 %v650_v56, %v474_v15  ;;  %v509_v39 = vsub.f32 1.0, %v505_v17 }
 0x254   :  { %v482_v38 = vadd.f32 0.2548296, %v478_v30  ;;  %v513_v22 = vmul.f32 %v509_v39, %v433_v9  ;;  %v515_v9 = vadd.f32 %v511_v51, %v954_v35 }
 0x256   :  { %v486_v43 = vmul.f32 %v650_v56, %v482_v38  ;;  %v517_v47 = vadd.f32 %v513_v22, %v966_v8  ;;  %v524_v8 = vadd.f32 %v520_v34, %v931_v3  ;;  %v539_v3 = vpop.permute.xlu1 %538 }
 0x258   :  { %v506_v49 = vmul.f32 %v658_v48, %v486_v43  ;;  %v521_v53 = vmul.f32 0.5, %v517_v47 }
 0x25a   :  { %v510_v50 = vsub.f32 1.0, %v506_v49  ;;  %v525_v63 = vadd.f32 %v521_v53, %v927_v36  ;;  %v534_v36 = vpop.permute.xlu0 %533 }
 0x25c   :  { %v514_v29 = vmul.f32 %v510_v50, %v434_v28  ;;  %v519_v28 = vmul.f32 0.5, %v515_v9 }
 0x25e   :  { %v518_v16 = vadd.f32 %v514_v29, %v972_v24  ;;  %v523_v27 = vadd.f32 %v519_v28, %v935_v10 }
 0x260   :  { %v522_v40 = vmul.f32 0.5, %v518_v16 }
 0x262   :  { %v526_v54 = vadd.f32 %v522_v40, %v923_v57  ;;  %v528_v57 = vld [vmem:[%s1023_s7 + $0x8] sm:$0xff]  ;;  %s688_s7 = smov 8  }
 0x264   :  { %559 = vmatpush.msra.mxu3 %v526_v54 }
 0x266   :  { %560 = vmatpush.msra.mxu3 %v525_v63 }
 0x268   :  { %561 = vmatpush.msra.mxu3 %v524_v8 }
 0x26a   :  { %562 = vmatpush.msra.mxu3 %v523_v27 }
 0x26b   :  { %602 = vmatmul.msk.f32.vlgmr.msra.gmra.mxu3 %vm224_vm1, %v527_v62 }
 0x273   :  { %603 = vmatmul.msk.f32.gmra.mxu3 %vm224_vm1, %v528_v57 }
 0x2ee   :  { %v564_v35 = vpop.f32.mrf.mxu3 }
 0x2ef   :  { %v565_v24 = vadd.f32 %v564_v35, %v534_v36 }
 0x2f1   :  { %570 = vst [vmem:[#allocation2] sm:$0xff] %v565_v24 }
 0x2f6   :  { %v567_v10 = vpop.f32.mrf.mxu3 }
 0x2f7   :  { %v568_v55 = vadd.f32 %v567_v10, %v539_v3 }
 0x2f9   :  { %571 = vst [vmem:[#allocation2 + $0x8] sm:$0xff] %v568_v55 }
 0x2fa   :  { %584 = dma.vmem_to_hbm [thread:$0]  %s577_s1, 256, %s579_s0, [#allocation3], %s687_s17, %s687_s17, %s688_s7  }
 0x2fb   :  { %683 = dma.done.wait [#allocation3], 256  }
 0x2fc   :  { %684 = vsyncadd [#allocation3], 4294967040 }
 0x2fd   :  { %589 = vsyncpa [#allocation3], 1 }

</bundles_post_ra>
